<compile_context>
chip_gen: v5e
topology: v5e:2x2
jax: 0.10.0
libtpu: 0.0.40
codegen_flags: <defaults>
</compile_context>

<pallas_src>
import math

import jax
import jax.numpy as jnp
from jax.experimental import pallas as pl
from jax.experimental.pallas import tpu as pltpu


def _round_up(n, m):
    return ((n + m - 1) // m) * m


def sae_kernel(x_ref, w1_ref, b1_ref, w2_ref, b2_ref, w3_ref, b3_ref,
               w4_ref, b4_ref, o_ref):
    """All four matmuls + sigmoids fused for one batch tile.

    Matmuls accumulate in f32 (preferred_element_type); activations run in f32
    (safe on v5e which has no bf16 VPU/EUP); hidden activations are cast back to
    the storage dtype only for the (tiny) MXU inputs of the next layer.
    """
    f32 = jnp.float32
    p_dtype = w2_ref.dtype            # parameter storage dtype (f32 or bf16)

    x = x_ref[...]
    # fc1: contract the movie (lane) axis of x with the movie (lane) axis of w1
    # (w1 is stored lane-dense as [20, nb_movies] == PyTorch fc1.weight layout).
    h = jax.lax.dot_general(
        x, w1_ref[...],
        dimension_numbers=(((1,), (1,)), ((), ())),
        preferred_element_type=f32)
    h = jax.nn.sigmoid(h + b1_ref[...].astype(f32))

    # fc2 / fc3: tiny [*, 20] x [20, 10] / [*, 10] x [10, 20] matmuls.
    h = jax.nn.sigmoid(
        jnp.dot(h.astype(p_dtype), w2_ref[...], preferred_element_type=f32)
        + b2_ref[...].astype(f32))
    h = jax.nn.sigmoid(
        jnp.dot(h.astype(p_dtype), w3_ref[...], preferred_element_type=f32)
        + b3_ref[...].astype(f32))

    # fc4: [*, 20] x [20, nb_movies], no activation.
    out = (jnp.dot(h.astype(p_dtype), w4_ref[...], preferred_element_type=f32)
           + b4_ref[...].astype(f32))
    o_ref[...] = out.astype(o_ref.dtype)


def _resident_spec(a):
    # Full-array block with a constant index_map: DMA'd once, then reused
    # (same block index every grid step => no re-fetch across the batch grid).
    return pl.BlockSpec(a.shape, lambda i: (0,) * a.ndim)


def sae_forward(x, params, *, tile_b=256):
    """x: [batch, nb_movies]; params as produced by init_params()."""
    w1, b1, w2, b2, w3, b3, w4, b4 = params
    batch, nb_movies = x.shape

    # Lane-dense padding of the movie axis (multiple of 128) and batch tiling.
    m_pad = _round_up(nb_movies, 128)
    tb = _round_up(min(tile_b, _round_up(batch, 8)), 8)
    b_pad = _round_up(batch, tb)

    x_p = jnp.pad(x, ((0, b_pad - batch), (0, m_pad - nb_movies)))
    w1_p = jnp.pad(w1, ((0, 0), (0, m_pad - nb_movies)))
    w4_p = jnp.pad(w4, ((0, 0), (0, m_pad - nb_movies)))
    b4_p = jnp.pad(b4, ((0, 0), (0, m_pad - nb_movies)))

    grid = (b_pad // tb,)

    # VMEM budget: double-buffered x/out tiles + (double-buffered) params +
    # headroom, capped at 48 MiB so we never request all of v7x's 64 MiB.
    param_bytes = sum(int(a.size) * a.dtype.itemsize
                      for a in (w1_p, b1, w2, b2, w3, b3, w4_p, b4_p))
    io_bytes = 2 * tb * m_pad * x.dtype.itemsize * 2
    vmem_limit = int(min(max(io_bytes + 2 * param_bytes + (2 << 20), 16 << 20),
                         48 << 20))

    in_specs = [
        pl.BlockSpec((tb, m_pad), lambda i: (i, 0)),   # x: pipelined batch tiles
        _resident_spec(w1_p), _resident_spec(b1),
        _resident_spec(w2), _resident_spec(b2),
        _resident_spec(w3), _resident_spec(b3),
        _resident_spec(w4_p), _resident_spec(b4_p),
    ]
    out_specs = pl.BlockSpec((tb, m_pad), lambda i: (i, 0))

    out = pl.pallas_call(
        sae_kernel,
        out_shape=jax.ShapeDtypeStruct((b_pad, m_pad), x.dtype),
        grid=grid,
        in_specs=in_specs,
        out_specs=out_specs,
        compiler_params=pltpu.CompilerParams(
            dimension_semantics=("parallel",),
            vmem_limit_bytes=vmem_limit),
    )(x_p, w1_p, b1, w2, b2, w3, b3, w4_p, b4_p)

    return out[:batch, :nb_movies]


def init_params(key, nb_movies, dtype=jnp.float32):
    """PyTorch nn.Linear-style init: U(-1/sqrt(fan_in), 1/sqrt(fan_in)).

    Layouts (all lane-dense on the large axis):
      w1: [20, nb_movies]  (== PyTorch fc1.weight, used as trans_b)
      w2: [20, 10], w3: [10, 20]          (in, out)
      w4: [20, nb_movies]                 (in, out)
      biases: [1, out]
    """
    specs = [
        (nb_movies, (20, nb_movies), 20),   # fc1: fan_in, w shape, out
        (20, (20, 10), 10),                 # fc2
        (10, (10, 20), 20),                 # fc3
        (20, (20, nb_movies), nb_movies),   # fc4
    ]
    params = []
    for fan_in, w_shape, out_f in specs:
        key, kw, kb = jax.random.split(key, 3)
        bound = 1.0 / math.sqrt(fan_in)
        w = jax.random.uniform(kw, w_shape, jnp.float32, -bound, bound)
        b = jax.random.uniform(kb, (1, out_f), jnp.float32, -bound, bound)
        params += [w.astype(dtype), b.astype(dtype)]
    return tuple(params)


def sae_reference(x, params):
    """Plain-JAX reference mirroring the kernel's dtype/accumulation choices."""
    w1, b1, w2, b2, w3, b3, w4, b4 = params
    f32 = jnp.float32
    p = w2.dtype
    h = jax.nn.sigmoid(
        jax.lax.dot_general(x, w1, (((1,), (1,)), ((), ())),
                            preferred_element_type=f32) + b1.astype(f32))
    h = jax.nn.sigmoid(
        jnp.dot(h.astype(p), w2, preferred_element_type=f32) + b2.astype(f32))
    h = jax.nn.sigmoid(
        jnp.dot(h.astype(p), w3, preferred_element_type=f32) + b3.astype(f32))
    out = jnp.dot(h.astype(p), w4, preferred_element_type=f32) + b4.astype(f32)
    return out.astype(x.dtype)


if __name__ == "__main__":
    # Small synthetic shapes (real nb_movies comes from the MovieLens dataset).
    # Deliberately not multiples of 128 / 8 to exercise the padding path.
    nb_movies = 250
    batch = 10

    key = jax.random.PRNGKey(0)
    key, kx = jax.random.split(key)
    x32 = jax.random.uniform(kx, (batch, nb_movies), jnp.float32)  # ratings in [0, 1)
    params32 = init_params(key, nb_movies, jnp.float32)

    # f32 storage path.
    out32 = jax.block_until_ready(sae_forward(x32, params32))
    ref32 = sae_reference(x32, params32)
    assert out32.shape == (batch, nb_movies)
    assert jnp.allclose(out32, ref32, atol=2e-3, rtol=2e-3)

    # bf16 storage path (halves HBM bytes on v6e/v7x; f32 accumulate inside).
    xbf = x32.astype(jnp.bfloat16)
    paramsbf = tuple(p.astype(jnp.bfloat16) for p in params32)
    outbf = jax.block_until_ready(sae_forward(xbf, paramsbf))
    refbf = sae_reference(xbf, paramsbf)
    assert outbf.shape == (batch, nb_movies) and outbf.dtype == jnp.bfloat16
    assert jnp.allclose(outbf.astype(jnp.float32), refbf.astype(jnp.float32),
                        atol=2e-2, rtol=2e-2)

    print("KERNEL_OK")
</pallas_src>

<mosaic_0001>
module attributes {stable_mosaic.version = 11 : i64} {
  func.func @sae_kernel(%arg0: i32, %arg1: memref<16x256xf32, #tpu.memory_space<vmem>>, %arg2: memref<20x256xf32, #tpu.memory_space<vmem>>, %arg3: memref<1x20xf32, #tpu.memory_space<vmem>>, %arg4: memref<20x10xf32, #tpu.memory_space<vmem>>, %arg5: memref<1x10xf32, #tpu.memory_space<vmem>>, %arg6: memref<10x20xf32, #tpu.memory_space<vmem>>, %arg7: memref<1x20xf32, #tpu.memory_space<vmem>>, %arg8: memref<20x256xf32, #tpu.memory_space<vmem>>, %arg9: memref<1x256xf32, #tpu.memory_space<vmem>>, %arg10: memref<16x256xf32, #tpu.memory_space<vmem>>) attributes {dimension_semantics = [#tpu.dimension_semantics<parallel>], iteration_bounds = array<i64: 1>, scalar_prefetch = 0 : i64, scratch_operands = 0 : i64, tpu.core_type = #tpu.core_type<tc>, window_params = [{transform_indices = @transform_0, window_bounds = array<i64: 16, 256>}, {pipeline_mode = #tpu.pipeline_mode<synchronous>, transform_indices = @transform_1, window_bounds = array<i64: 20, 256>}, {pipeline_mode = #tpu.pipeline_mode<synchronous>, transform_indices = @transform_2, window_bounds = array<i64: 1, 20>}, {pipeline_mode = #tpu.pipeline_mode<synchronous>, transform_indices = @transform_3, window_bounds = array<i64: 20, 10>}, {pipeline_mode = #tpu.pipeline_mode<synchronous>, transform_indices = @transform_4, window_bounds = array<i64: 1, 10>}, {pipeline_mode = #tpu.pipeline_mode<synchronous>, transform_indices = @transform_5, window_bounds = array<i64: 10, 20>}, {pipeline_mode = #tpu.pipeline_mode<synchronous>, transform_indices = @transform_6, window_bounds = array<i64: 1, 20>}, {pipeline_mode = #tpu.pipeline_mode<synchronous>, transform_indices = @transform_7, window_bounds = array<i64: 20, 256>}, {pipeline_mode = #tpu.pipeline_mode<synchronous>, transform_indices = @transform_8, window_bounds = array<i64: 1, 256>}, {transform_indices = @transform_9, window_bounds = array<i64: 16, 256>}]} {
    %c0 = arith.constant 0 : index
    %c0_0 = arith.constant 0 : index
    %0 = vector.load %arg1[%c0, %c0_0] : memref<16x256xf32, #tpu.memory_space<vmem>>, vector<16x256xf32>
    %c0_1 = arith.constant 0 : index
    %c0_2 = arith.constant 0 : index
    %1 = vector.load %arg2[%c0_1, %c0_2] : memref<20x256xf32, #tpu.memory_space<vmem>>, vector<20x256xf32>
    %cst = arith.constant dense<0.000000e+00> : vector<16x20xf32>
    %2 = tpu.matmul %0, %1, %cst {dimension_numbers = #tpu.dot_dimension_numbers<[1], [1], [0], [0], [0, 0, 1, 0], [], []>} : vector<16x256xf32>, vector<20x256xf32>, vector<16x20xf32> -> vector<16x20xf32>
    %c0_3 = arith.constant 0 : index
    %c0_4 = arith.constant 0 : index
    %3 = vector.load %arg3[%c0_3, %c0_4] : memref<1x20xf32, #tpu.memory_space<vmem>>, vector<1x20xf32>
    %4 = vector.broadcast %3 : vector<1x20xf32> to vector<16x20xf32>
    %5 = arith.addf %2, %4 : vector<16x20xf32>
    %6 = arith.negf %5 : vector<16x20xf32>
    %7 = math.exp %6 : vector<16x20xf32>
    %cst_5 = arith.constant 1.000000e+00 : f32
    %8 = vector.broadcast %cst_5 : f32 to vector<16x20xf32>
    %9 = arith.addf %8, %7 : vector<16x20xf32>
    %10 = arith.divf %8, %9 : vector<16x20xf32>
    %c0_6 = arith.constant 0 : index
    %c0_7 = arith.constant 0 : index
    %11 = vector.load %arg4[%c0_6, %c0_7] : memref<20x10xf32, #tpu.memory_space<vmem>>, vector<20x10xf32>
    %cst_8 = arith.constant dense<0.000000e+00> : vector<16x10xf32>
    %12 = tpu.matmul %10, %11, %cst_8 {dimension_numbers = #tpu.dot_dimension_numbers<[1], [0], [0], [1], [0, 0, 1, 1], [], []>} : vector<16x20xf32>, vector<20x10xf32>, vector<16x10xf32> -> vector<16x10xf32>
    %c0_9 = arith.constant 0 : index
    %c0_10 = arith.constant 0 : index
    %13 = vector.load %arg5[%c0_9, %c0_10] : memref<1x10xf32, #tpu.memory_space<vmem>>, vector<1x10xf32>
    %14 = vector.broadcast %13 : vector<1x10xf32> to vector<16x10xf32>
    %15 = arith.addf %12, %14 : vector<16x10xf32>
    %16 = arith.negf %15 : vector<16x10xf32>
    %17 = math.exp %16 : vector<16x10xf32>
    %cst_11 = arith.constant 1.000000e+00 : f32
    %18 = vector.broadcast %cst_11 : f32 to vector<16x10xf32>
    %19 = arith.addf %18, %17 : vector<16x10xf32>
    %20 = arith.divf %18, %19 : vector<16x10xf32>
    %c0_12 = arith.constant 0 : index
    %c0_13 = arith.constant 0 : index
    %21 = vector.load %arg6[%c0_12, %c0_13] : memref<10x20xf32, #tpu.memory_space<vmem>>, vector<10x20xf32>
    %cst_14 = arith.constant dense<0.000000e+00> : vector<16x20xf32>
    %22 = tpu.matmul %20, %21, %cst_14 {dimension_numbers = #tpu.dot_dimension_numbers<[1], [0], [0], [1], [0, 0, 1, 1], [], []>} : vector<16x10xf32>, vector<10x20xf32>, vector<16x20xf32> -> vector<16x20xf32>
    %c0_15 = arith.constant 0 : index
    %c0_16 = arith.constant 0 : index
    %23 = vector.load %arg7[%c0_15, %c0_16] : memref<1x20xf32, #tpu.memory_space<vmem>>, vector<1x20xf32>
    %24 = vector.broadcast %23 : vector<1x20xf32> to vector<16x20xf32>
    %25 = arith.addf %22, %24 : vector<16x20xf32>
    %26 = arith.negf %25 : vector<16x20xf32>
    %27 = math.exp %26 : vector<16x20xf32>
    %cst_17 = arith.constant 1.000000e+00 : f32
    %28 = vector.broadcast %cst_17 : f32 to vector<16x20xf32>
    %29 = arith.addf %28, %27 : vector<16x20xf32>
    %30 = arith.divf %28, %29 : vector<16x20xf32>
    %c0_18 = arith.constant 0 : index
    %c0_19 = arith.constant 0 : index
    %31 = vector.load %arg8[%c0_18, %c0_19] : memref<20x256xf32, #tpu.memory_space<vmem>>, vector<20x256xf32>
    %cst_20 = arith.constant dense<0.000000e+00> : vector<16x256xf32>
    %32 = tpu.matmul %30, %31, %cst_20 {dimension_numbers = #tpu.dot_dimension_numbers<[1], [0], [0], [1], [0, 0, 1, 1], [], []>} : vector<16x20xf32>, vector<20x256xf32>, vector<16x256xf32> -> vector<16x256xf32>
    %c0_21 = arith.constant 0 : index
    %c0_22 = arith.constant 0 : index
    %33 = vector.load %arg9[%c0_21, %c0_22] : memref<1x256xf32, #tpu.memory_space<vmem>>, vector<1x256xf32>
    %34 = vector.broadcast %33 : vector<1x256xf32> to vector<16x256xf32>
    %35 = arith.addf %32, %34 : vector<16x256xf32>
    %c0_23 = arith.constant 0 : index
    %c0_24 = arith.constant 0 : index
    %36 = vector.load %arg10[%c0_23, %c0_24] : memref<16x256xf32, #tpu.memory_space<vmem>>, vector<16x256xf32>
    tpu.vector_store %arg10[%c0_23, %c0_24], %35 {strides = array<i32>} : memref<16x256xf32, #tpu.memory_space<vmem>>, vector<16x256xf32>,
    return
  }
  func.func @transform_0(%arg0: i32) -> (i32, i32) {
    %c0_i32 = arith.constant 0 : i32
    %c0_i32_0 = arith.constant 0 : i32
    return %arg0, %c0_i32 : i32, i32
  }
  func.func @transform_1(%arg0: i32) -> (i32, i32) {
    %c0_i32 = arith.constant 0 : i32
    %c0_i32_0 = arith.constant 0 : i32
    %c0_i32_1 = arith.constant 0 : i32
    return %c0_i32, %c0_i32_0 : i32, i32
  }
  func.func @transform_2(%arg0: i32) -> (i32, i32) {
    %c0_i32 = arith.constant 0 : i32
    %c0_i32_0 = arith.constant 0 : i32
    %c0_i32_1 = arith.constant 0 : i32
    return %c0_i32, %c0_i32_0 : i32, i32
  }
  func.func @transform_3(%arg0: i32) -> (i32, i32) {
    %c0_i32 = arith.constant 0 : i32
    %c0_i32_0 = arith.constant 0 : i32
    %c0_i32_1 = arith.constant 0 : i32
    return %c0_i32, %c0_i32_0 : i32, i32
  }
  func.func @transform_4(%arg0: i32) -> (i32, i32) {
    %c0_i32 = arith.constant 0 : i32
    %c0_i32_0 = arith.constant 0 : i32
    %c0_i32_1 = arith.constant 0 : i32
    return %c0_i32, %c0_i32_0 : i32, i32
  }
  func.func @transform_5(%arg0: i32) -> (i32, i32) {
    %c0_i32 = arith.constant 0 : i32
    %c0_i32_0 = arith.constant 0 : i32
    %c0_i32_1 = arith.constant 0 : i32
    return %c0_i32, %c0_i32_0 : i32, i32
  }
  func.func @transform_6(%arg0: i32) -> (i32, i32) {
    %c0_i32 = arith.constant 0 : i32
    %c0_i32_0 = arith.constant 0 : i32
    %c0_i32_1 = arith.constant 0 : i32
    return %c0_i32, %c0_i32_0 : i32, i32
  }
  func.func @transform_7(%arg0: i32) -> (i32, i32) {
    %c0_i32 = arith.constant 0 : i32
    %c0_i32_0 = arith.constant 0 : i32
    %c0_i32_1 = arith.constant 0 : i32
    return %c0_i32, %c0_i32_0 : i32, i32
  }
  func.func @transform_8(%arg0: i32) -> (i32, i32) {
    %c0_i32 = arith.constant 0 : i32
    %c0_i32_0 = arith.constant 0 : i32
    %c0_i32_1 = arith.constant 0 : i32
    return %c0_i32, %c0_i32_0 : i32, i32
  }
  func.func @transform_9(%arg0: i32) -> (i32, i32) {
    %c0_i32 = arith.constant 0 : i32
    %c0_i32_0 = arith.constant 0 : i32
    return %arg0, %c0_i32 : i32, i32
  }
}

</mosaic_0001>

<bundles_post_ra>
// kernel: tpu_custom_call.1
= control target key start
LH: loop header
LB: loop body
LE: loop exit
PB: predicated region body
PF: predicated region fallthrough
CT: control target
= control target key end

     0   :  { %14 = vsyncpa [#allocation3], 0  ;;  %s711_s0 = inlined_call_operand.vmem [shape: f32[16,256], index: 0, kind: input, shape index: {}]   ;;  %s712_s1 = inlined_call_operand.hbm [shape: f32[20,256], index: 1, kind: input, shape index: {}]   ;;  %s713_s2 = inlined_call_operand.vmem [shape: f32[1,20], index: 2, kind: input, shape index: {}]   ;;  %s714_s3 = inlined_call_operand.vmem [shape: f32[20,10], index: 3, kind: input, shape index: {}]   ;;  %s715_s4 = inlined_call_operand.vmem [shape: f32[1,10], index: 4, kind: input, shape index: {}]   ;;  %s716_s5 = inlined_call_operand.hbm [shape: f32[10,20], index: 5, kind: input, shape index: {}]   ;;  %s717_s6 = inlined_call_operand.vmem [shape: f32[1,20], index: 6, kind: input, shape index: {}]   ;;  %s718_s7 = inlined_call_operand.hbm [shape: f32[20,256], index: 7, kind: input, shape index: {}]   ;;  %s719_s8 = inlined_call_operand.vmem [shape: f32[1,256], index: 8, kind: input, shape index: {}]   ;;  %s720_s9 = inlined_call_operand.hbm [shape: f32[16,256], index: 9, kind: output, shape index: {}]  }
   0x1   :  { %15 = vsyncpa [#allocation6], 0  ;;  %s42_s11 = sshll.u32 %s716_s5, 4  ;;  %s43_s11 = int_to_ptr.hbm [resolvable:$true] %s42_s11 }
   0x2   :  { %16 = vsyncpa [#allocation4], 0  ;;  %s587_s12 = smov [#allocation5]   ;;  %s23_s16 = sshll.u32 %s712_s1, 4  ;;  %s24_s16 = int_to_ptr.hbm [resolvable:$true] %s23_s16 }
   0x3   :  { %s44_s13 = sshll.u32 %s587_s12, 4  ;;  %s588_s17 = smov 128   ;;  %s45_s13 = int_to_ptr.vmem [resolvable:$true] %s44_s13 }
   0x4   :  { %s589_s18 = smov 8   ;;  %s590_s19 = smov [#allocation2]  }
   0x5   :  { %50 = dma.hbm_to_vmem [thread:$0]  %s43_s11, 256, %s45_s13, [#allocation6], %s588_s17, %s588_s17, %s589_s18  }
   0x6   :  { %s25_s20 = sshll.u32 %s590_s19, 4  ;;  %s591_s21 = smov 256   ;;  %s26_s20 = int_to_ptr.vmem [resolvable:$true] %s25_s20 }
   0x7   :  { %s592_s22 = smov 16   ;;  %s57_s24 = sshll.u32 %s718_s7, 4  ;;  %s58_s24 = int_to_ptr.hbm [resolvable:$true] %s57_s24 }
   0x8   :  { %31 = dma.hbm_to_vmem [thread:$0]  %s24_s16, 768, %s26_s20, [#allocation3], %s591_s21, %s591_s21, %s592_s22  }
   0x9   :  { %s593_s25 = smov [#allocation7]  }
   0xa   :  { %s59_s1 = sshll.u32 %s593_s25, 4  ;;  %s60_s1 = int_to_ptr.vmem [resolvable:$true] %s59_s1 }
   0xb   :  { %65 = dma.hbm_to_vmem [thread:$0]  %s58_s24, 768, %s60_s1, [#allocation6], %s591_s21, %s591_s21, %s592_s22  }
   0xc   :  { %581 = dma.done.wait [#allocation3], 768  }
   0xd   :  { %582 = vsyncadd [#allocation3], 4294966528 }
   0xe   :  { %583 = dma.done.wait [#allocation6], 1024  }
   0xf   :  { %584 = vsyncadd [#allocation6], 4294966272  ;;  %v88_v0 = vld [vmem:[#allocation2 + $0x20] sm:$0xf]  ;;  %v89_v1 = vld [vmem:[#allocation2 + $0x28] sm:$0xf] }
  0x10   :  { %107 = vmatpush.xpose.msra.mxu0 %v88_v0  ;;  %130 = vmatpush.xpose.msra.mxu1 %v89_v1  ;;  %v86_v2 = vld [vmem:[#allocation2 + $0x10] sm:$0xff]  ;;  %v87_v3 = vld [vmem:[#allocation2 + $0x18] sm:$0xff]  ;;  %v84_v4 = vld [vmem:[#allocation2] sm:$0xff]  ;;  %vm192_vm0 = vcmask 1043456   ;;  %vm185_vm4 = vcmask 162816   ;;  %vm270_vm10 = vcmask 1041408  }
  0x11   :  { %v85_v5 = vld [vmem:[#allocation2 + $0x8] sm:$0xff]  ;;  %v80_v6 = vld [vmem:[%s711_s0] sm:$0xff]  ;;  %v82_v8 = vld [vmem:[%s711_s0 + $0x10] sm:$0xff]  ;;  %vm263_vm14 = vcmask 80896   ;;  %s594_s5 = smov [#allocation8]   ;;  %s415_s1 = sshll.u32 %s720_s9, 4  ;;  %s416_s1 = int_to_ptr.hbm [resolvable:$true] %s415_s1 }
  0x12   :  { %v81_v7 = vld [vmem:[%s711_s0 + $0x8] sm:$0xff]  ;;  %v83_v9 = vld [vmem:[%s711_s0 + $0x18] sm:$0xff]  ;;  %v180_v10 = vld [vmem:[%s714_s3 + $0x10] sm:$0xf]  ;;  %s413_s23 = sshll.u32 %s594_s5, 4  ;;  %s414_s23 = int_to_ptr.vmem [resolvable:$true] %s413_s23 }
  0x13   :  { %v179_v11 = vld [vmem:[%s714_s3 + $0x8] sm:$0xff]  ;;  %447 = vmatpush.msk.msra.mxu2 %vm192_vm0, %v180_v10  ;;  %v178_v12 = vld [vmem:[%s714_s3] sm:$0xff]  ;;  %v258_v48 = vld [vmem:[#allocation5 + $0x8] sm:$0x3] }
  0x14   :  { %108 = vmatpush.xpose.msra.mxu0 %v86_v2  ;;  %131 = vmatpush.xpose.msra.mxu1 %v87_v3  ;;  %v458_v13 = vld [vmem:[%s713_s2] ss:$0 sm:$0xff]  ;;  %v257_v49 = vld [vmem:[#allocation5] sm:$0xff] }
  0x15   :  { %448 = vmatpush.msra.mxu2 %v179_v11  ;;  %436 = vmatpush.msk.msra.mxu3 %vm270_vm10, %v258_v48  ;;  %v459_v50 = vld [vmem:[%s715_s4] ss:$0 sm:$0xff] }
  0x17   :  { %449 = vmatpush.msra.mxu2 %v178_v12  ;;  %289 = vmatpush.msra.mxu3 %v257_v49 }
  0x18   :  { %109 = vmatpush.xpose.msra.mxu0 %v84_v4  ;;  %132 = vmatpush.xpose.msra.mxu1 %v85_v5 }
  0x1b   :  { %110 = vmatmul.f32.vlgmr.msra.gmra.mxu0 %v80_v6  ;;  %133 = vmatmul.f32.vlgmr.msra.gmra.mxu1 %v81_v7 }
  0x1c   :  { %431 = vmatpush.msk.msrb.mxu0 %vm192_vm0, %v180_v10 }
  0x1e   :  { %210 = vmatpush.msrb.mxu0 %v179_v11 }
  0x20   :  { %211 = vmatpush.msrb.mxu0 %v178_v12 }
  0x23   :  { %113 = vmatmul.f32.gmra.mxu0 %v82_v8  ;;  %136 = vmatmul.f32.gmra.mxu1 %v83_v9 }
  0x98   :  { %v111_v14 = vpop.f32.mrf.mxu0  ;;  %v134_v15 = vpop.f32.mrf.mxu1 }
  0x99   :  { %v112_v16 = vadd.f32 %v458_v13, %v111_v14 }
  0x9b   :  { %v135_v17 = vadd.f32 %v134_v15, %v112_v16 }
  0x9d   :  { %v429_v18 = vmul.f32 -1.442695, %v135_v17  ;;  %v339_v17 = vld [vmem:[#allocation7 + $0x20] sm:$0xf] }
  0x9e   :  { %441 = vmatpush.msk.msrb.mxu3 %vm192_vm0, %v339_v17 }
  0x9f   :  { %461 = vpow2.f32 %v429_v18  ;;  %v340_v18 = vld [vmem:[#allocation7 + $0x28] sm:$0xf] }
  0xa0   :  { %v114_v19 = vpop.f32.mrf.mxu0  ;;  %v137_v20 = vpop.f32.mrf.mxu1  ;;  %444 = vmatpush.msk.msrb.mxu2 %vm192_vm0, %v340_v18 }
  0xa1   :  { %v115_v21 = vadd.f32 %v458_v13, %v114_v19  ;;  %v337_v19 = vld [vmem:[#allocation7 + $0x10] sm:$0xff] }
  0xa2   :  { %373 = vmatpush.msrb.mxu3 %v337_v19 }
  0xa3   :  { %v138_v22 = vadd.f32 %v137_v20, %v115_v21  ;;  %v338_v20 = vld [vmem:[#allocation7 + $0x18] sm:$0xff]  ;;  %v335_v21 = vld [vmem:[#allocation7] sm:$0xff] }
  0xa4   :  { %396 = vmatpush.msrb.mxu2 %v338_v20  ;;  %374 = vmatpush.msrb.mxu3 %v335_v21 }
  0xa5   :  { %v462_v23 = vpop.eup %461  ;;  %v430_v24 = vmul.f32 -1.442695, %v138_v22  ;;  %v336_v22 = vld [vmem:[#allocation7 + $0x8] sm:$0xff] }
  0xa6   :  { %v146_v25 = vadd.f32 1.0, %v462_v23  ;;  %v460_v23 = vld [vmem:[%s717_s6] ss:$0 sm:$0xff]  ;;  %397 = vmatpush.msrb.mxu2 %v336_v22 }
  0xa7   :  { %463 = vpow2.f32 %v430_v24 }
  0xa8   :  { %465 = vrcp.f32 %v146_v25  ;;  %v159_v31 = vand.u32 2147483648, %v146_v25  ;;  %v157_v33 = vand.u32 2147483647, %v146_v25  ;;  %vm153_vm2 = vweird.f32 %v146_v25 }
  0xaa   :  { %v160_v36 = vor.u32 1.1754944e-38, %v159_v31  ;;  %vm158_vm5 = vcmp.eq.f32.partialorder %v157_v33, 8.507059e+37 }
  0xad   :  { %v464_v26 = vpop.eup %463 }
  0xae   :  { %v466_v27 = vpop.eup %465  ;;  %v147_v28 = vadd.f32 1.0, %v464_v26 }
  0xaf   :  { %v149_v29 = vmul.f32 %v466_v27, %v146_v25  ;;  %vm154_vm1 = vweird.f32 %v466_v27 }
  0xb0   :  { %467 = vrcp.f32 %v147_v28  ;;  %vm155_vm3 = vmor %vm153_vm2, %vm154_vm1  ;;  %v174_v41 = vand.u32 2147483648, %v147_v28  ;;  %v172_v43 = vand.u32 2147483647, %v147_v28  ;;  %vm168_vm7 = vweird.f32 %v147_v28 }
  0xb1   :  { %v150_v30 = vsub.f32 1.0, %v149_v29 }
  0xb2   :  { %v175_v45 = vor.u32 1.1754944e-38, %v174_v41  ;;  %vm173_vm9 = vcmp.eq.f32.partialorder %v172_v43, 8.507059e+37 }
  0xb3   :  { %v151_v32 = vmul.f32 %v466_v27, %v150_v30 }
  0xb5   :  { %v152_v34 = vadd.f32 %v466_v27, %v151_v32 }
  0xb6   :  { %v468_v35 = vpop.eup %467 }
  0xb7   :  { %v156_v37 = vsel %vm155_vm3, %v466_v27, %v152_v34  ;;  %v164_v38 = vmul.f32 %v468_v35, %v147_v28  ;;  %vm169_vm6 = vweird.f32 %v468_v35 }
  0xb8   :  { %v161_v39 = vsel %vm158_vm5, %v160_v36, %v156_v37  ;;  %vm170_vm8 = vmor %vm168_vm7, %vm169_vm6 }
  0xb9   :  { %432 = vmatmul.msk.f32.vlgmr.msrb.gmra.mxu0 %vm185_vm4, %v161_v39  ;;  %v165_v40 = vsub.f32 1.0, %v164_v38 }
  0xbb   :  { %v166_v42 = vmul.f32 %v468_v35, %v165_v40 }
  0xbd   :  { %v167_v44 = vadd.f32 %v468_v35, %v166_v42 }
  0xbf   :  { %v171_v46 = vsel %vm170_vm8, %v468_v35, %v167_v44 }
  0xc0   :  { %v176_v47 = vsel %vm173_vm9, %v175_v45, %v171_v46 }
  0xc1   :  { %433 = vmatmul.msk.f32.vlgmr.msra.gmra.mxu2 %vm185_vm4, %v176_v47 }
 0x136   :  { %v213_v51 = vpop.f32.mrf.mxu0 }
 0x137   :  { %v214_v52 = vadd.f32 %v459_v50, %v213_v51 }
 0x139   :  { %v434_v53 = vmul.f32 -1.442695, %v214_v52 }
 0x13b   :  { %469 = vpow2.f32 %v434_v53 }
 0x141   :  { %v470_v54 = vpop.eup %469 }
 0x142   :  { %v225_v55 = vadd.f32 1.0, %v470_v54  ;;  %v341_v54 = vld [vmem:[%s719_s8] sm:$0x3] }
 0x144   :  { %471 = vrcp.f32 %v225_v55  ;;  %v216_v56 = vpop.f32.mrf.mxu2  ;;  %v238_v62 = vand.u32 2147483648, %v225_v55  ;;  %v236_v1 = vand.u32 2147483647, %v225_v55  ;;  %vm232_vm12 = vweird.f32 %v225_v55 }
 0x145   :  { %v217_v57 = vadd.f32 %v459_v50, %v216_v56  ;;  %v344_v56 = vperm.slane %v341_v54, 1 }
 0x146   :  { %v239_v4 = vor.u32 1.1754944e-38, %v238_v62  ;;  %vm237_vm15 = vcmp.eq.f32.partialorder %v236_v1, 8.507059e+37 }
 0x147   :  { %v435_v58 = vmul.f32 -1.442695, %v217_v57 }
 0x149   :  { %473 = vpow2.f32 %v435_v58 }
 0x14a   :  { %v472_v59 = vpop.eup %471 }
 0x14b   :  { %v228_v60 = vmul.f32 %v472_v59, %v225_v55  ;;  %vm233_vm11 = vweird.f32 %v472_v59  ;;  %v343_v55 = vperm.slane %v341_v54, 0 }
 0x14c   :  { %vm234_vm13 = vmor %vm232_vm12, %vm233_vm11 }
 0x14d   :  { %v229_v61 = vsub.f32 1.0, %v228_v60 }
 0x14f   :  { %v474_v63 = vpop.eup %473  ;;  %v230_v0 = vmul.f32 %v472_v59, %v229_v61 }
 0x150   :  { %v226_v2 = vadd.f32 1.0, %v474_v63 }
 0x151   :  { %v231_v3 = vadd.f32 %v472_v59, %v230_v0 }
 0x152   :  { %475 = vrcp.f32 %v226_v2  ;;  %v253_v10 = vand.u32 2147483648, %v226_v2  ;;  %v251_v12 = vand.u32 2147483647, %v226_v2  ;;  %vm247_vm2 = vweird.f32 %v226_v2 }
 0x153   :  { %v235_v5 = vsel %vm234_vm13, %v472_v59, %v231_v3 }
 0x154   :  { %v240_v6 = vsel %vm237_vm15, %v239_v4, %v235_v5  ;;  %v254_v14 = vor.u32 1.1754944e-38, %v253_v10  ;;  %vm252_vm5 = vcmp.eq.f32.partialorder %v251_v12, 8.507059e+37 }
 0x155   :  { %437 = vmatmul.msk.f32.vlgmr.msra.gmra.mxu3 %vm263_vm14, %v240_v6 }
 0x158   :  { %v476_v7 = vpop.eup %475 }
 0x159   :  { %v243_v8 = vmul.f32 %v476_v7, %v226_v2  ;;  %vm248_vm1 = vweird.f32 %v476_v7 }
 0x15a   :  { %vm249_vm3 = vmor %vm247_vm2, %vm248_vm1 }
 0x15b   :  { %v244_v9 = vsub.f32 1.0, %v243_v8 }
 0x15d   :  { %v245_v11 = vmul.f32 %v476_v7, %v244_v9 }
 0x15f   :  { %v246_v13 = vadd.f32 %v476_v7, %v245_v11 }
 0x161   :  { %v250_v15 = vsel %vm249_vm3, %v476_v7, %v246_v13 }
 0x162   :  { %v255_v16 = vsel %vm252_vm5, %v254_v14, %v250_v15 }
 0x163   :  { %438 = vmatmul.msk.f32.gmra.mxu3 %vm263_vm14, %v255_v16 }
 0x1d8   :  { %v291_v24 = vpop.f32.mrf.mxu3 }
 0x1d9   :  { %v292_v25 = vadd.f32 %v460_v23, %v291_v24 }
 0x1db   :  { %v439_v26 = vmul.f32 -1.442695, %v292_v25 }
 0x1dd   :  { %477 = vpow2.f32 %v439_v26 }
 0x1e3   :  { %v478_v27 = vpop.eup %477 }
 0x1e4   :  { %v303_v28 = vadd.f32 1.0, %v478_v27 }
 0x1e6   :  { %479 = vrcp.f32 %v303_v28  ;;  %v294_v29 = vpop.f32.mrf.mxu3  ;;  %v316_v35 = vand.u32 2147483648, %v303_v28  ;;  %v314_v38 = vand.u32 2147483647, %v303_v28  ;;  %vm310_vm6 = vweird.f32 %v303_v28 }
 0x1e7   :  { %v295_v30 = vadd.f32 %v460_v23, %v294_v29 }
 0x1e8   :  { %v317_v41 = vor.u32 1.1754944e-38, %v316_v35  ;;  %vm315_vm8 = vcmp.eq.f32.partialorder %v314_v38, 8.507059e+37 }
 0x1e9   :  { %v440_v31 = vmul.f32 -1.442695, %v295_v30 }
 0x1eb   :  { %481 = vpow2.f32 %v440_v31 }
 0x1ec   :  { %v480_v32 = vpop.eup %479 }
 0x1ed   :  { %v306_v33 = vmul.f32 %v480_v32, %v303_v28  ;;  %vm311_vm0 = vweird.f32 %v480_v32 }
 0x1ee   :  { %vm312_vm7 = vmor %vm310_vm6, %vm311_vm0 }
 0x1ef   :  { %v307_v34 = vsub.f32 1.0, %v306_v33 }
 0x1f1   :  { %v482_v36 = vpop.eup %481  ;;  %v308_v37 = vmul.f32 %v480_v32, %v307_v34 }
 0x1f2   :  { %v304_v39 = vadd.f32 1.0, %v482_v36 }
 0x1f3   :  { %v309_v40 = vadd.f32 %v480_v32, %v308_v37 }
 0x1f4   :  { %483 = vrcp.f32 %v304_v39  ;;  %v331_v47 = vand.u32 2147483648, %v304_v39  ;;  %v329_v49 = vand.u32 2147483647, %v304_v39  ;;  %vm325_vm10 = vweird.f32 %v304_v39 }
 0x1f5   :  { %v313_v42 = vsel %vm312_vm7, %v480_v32, %v309_v40 }
 0x1f6   :  { %v318_v43 = vsel %vm315_vm8, %v317_v41, %v313_v42  ;;  %v332_v51 = vor.u32 1.1754944e-38, %v331_v47  ;;  %vm330_vm12 = vcmp.eq.f32.partialorder %v329_v49, 8.507059e+37 }
 0x1f7   :  { %442 = vmatmul.msk.f32.vlgmr.msrb.gmra.mxu3 %vm185_vm4, %v318_v43  ;;  %445 = vmatmul.msk.f32.vlgmr.msrb.gmra.mxu2 %vm185_vm4, %v318_v43 }
 0x1fa   :  { %v484_v44 = vpop.eup %483 }
 0x1fb   :  { %v321_v45 = vmul.f32 %v484_v44, %v304_v39  ;;  %vm326_vm9 = vweird.f32 %v484_v44 }
 0x1fc   :  { %vm327_vm11 = vmor %vm325_vm10, %vm326_vm9 }
 0x1fd   :  { %v322_v46 = vsub.f32 1.0, %v321_v45 }
 0x1ff   :  { %v323_v48 = vmul.f32 %v484_v44, %v322_v46 }
 0x201   :  { %v324_v50 = vadd.f32 %v484_v44, %v323_v48 }
 0x203   :  { %v328_v52 = vsel %vm327_vm11, %v484_v44, %v324_v50 }
 0x204   :  { %v333_v53 = vsel %vm330_vm12, %v332_v51, %v328_v52 }
 0x205   :  { %443 = vmatmul.msk.f32.gmra.mxu3 %vm185_vm4, %v333_v53  ;;  %446 = vmatmul.msk.f32.gmra.mxu2 %vm185_vm4, %v333_v53 }
 0x27a   :  { %v376_v57 = vpop.f32.mrf.mxu3  ;;  %v399_v58 = vpop.f32.mrf.mxu2 }
 0x27b   :  { %v377_v59 = vadd.f32 %v376_v57, %v343_v55  ;;  %v400_v60 = vadd.f32 %v399_v58, %v344_v56 }
 0x27d   :  { %405 = vst [vmem:[#allocation8] sm:$0xff] %v377_v59 }
 0x27e   :  { %406 = vst [vmem:[#allocation8 + $0x8] sm:$0xff] %v400_v60 }
 0x288   :  { %v379_v61 = vpop.f32.mrf.mxu3  ;;  %v402_v62 = vpop.f32.mrf.mxu2 }
 0x289   :  { %v380_v63 = vadd.f32 %v379_v61, %v343_v55  ;;  %v403_v0 = vadd.f32 %v402_v62, %v344_v56 }
 0x28b   :  { %407 = vst [vmem:[#allocation8 + $0x10] sm:$0xff] %v380_v63 }
 0x28c   :  { %408 = vst [vmem:[#allocation8 + $0x18] sm:$0xff] %v403_v0 }
 0x28d   :  { %421 = dma.vmem_to_hbm [thread:$0]  %s414_s23, 512, %s416_s1, [#allocation4], %s591_s21, %s591_s21, %s592_s22  }
 0x28e   :  { %585 = dma.done.wait [#allocation4], 512  }
 0x28f   :  { %586 = vsyncadd [#allocation4], 4294966784 }
 0x290   :  { %426 = vsyncpa [#allocation3], 1 }
 0x291   :  { %427 = vsyncpa [#allocation6], 1 }
 0x292   :  { %428 = vsyncpa [#allocation4], 1 }

</bundles_post_ra>
